<compile_context>
chip_gen: v7x
topology: tpu7x:2x2x1
jax: 0.10.0
libtpu: 0.0.40
codegen_flags: <defaults>
</compile_context>

<pallas_src>
import jax
import jax.numpy as jnp
from jax.experimental import pallas as pl
from jax.experimental.pallas import tpu as pltpu

EPS = 1e-8

# ~2 MiB per block; with input+output each double-buffered that is ~8 MiB VMEM,
# comfortably inside the default scoped limit on v5e/v6e/v7x.
_BLOCK_BUDGET_BYTES = 2 * 1024 * 1024


def _pixelnorm_kernel(x_ref, o_ref):
    # Block: (1, C, row_tile, lane) -- C is a leading axis, lane is 128-dense.
    x = x_ref[...]                                   # narrow dtype stays narrow
    xf = x.astype(jnp.float32)
    ms = jnp.mean(xf * xf, axis=1, keepdims=True)    # cross-vreg VPU adds over C
    inv = jax.lax.rsqrt(ms + EPS)                    # EUP rsqrt (free slot)
    # Epilogue multiply in the input dtype (no second full-f32 tile for bf16).
    o_ref[...] = (x * inv.astype(x.dtype)).astype(o_ref.dtype)


def _choose_tiling(C, S, itemsize):
    """Pick (lane, rows, row_tile) with rows*lane == S, lane % 128 == 0,
    row_tile | rows and (row_tile % 8 == 0 or row_tile == rows), keeping one
    block (C * row_tile * lane * itemsize) near the VMEM block budget.
    Returns None if S is not a multiple of 128 (caller uses fallback)."""
    if S % 128 != 0:
        return None
    lane_cands = [L for L in range(128, S + 1, 128) if S % L == 0]
    lane_cands.sort(reverse=True)
    for lane in lane_cands:
        rows = S // lane
        row_bytes = C * lane * itemsize
        # Whole (flattened) spatial extent fits in one lane-dense block.
        if rows * row_bytes <= _BLOCK_BUDGET_BYTES:
            return lane, rows, rows
        # Otherwise split rows into (8, 128)-legal tiles that fit the budget.
        if rows % 8 == 0:
            fits = [t for t in range(8, rows + 1, 8)
                    if rows % t == 0 and t * row_bytes <= _BLOCK_BUDGET_BYTES]
            if fits:
                return lane, rows, max(fits)
    # Nothing met the budget: smallest legal footprint (still lane-dense).
    lane = 128
    rows = S // lane
    row_tile = 8 if (rows % 8 == 0 and rows >= 8) else rows
    return lane, rows, row_tile


def pixel_norm(x: jax.Array) -> jax.Array:
    """PixelNorm over the channel axis of an NCHW tensor."""
    N, C, H, W = x.shape
    S = H * W
    itemsize = jnp.dtype(x.dtype).itemsize

    tiling = _choose_tiling(C, S, itemsize)
    if tiling is None:
        # S not a multiple of 128: one full-spatial block per image
        # (block last-two dims equal the full array dims -> always legal).
        lane, rows, row_tile = S, 1, 1
    else:
        lane, rows, row_tile = tiling

    x4 = x.reshape(N, C, rows, lane)
    grid = (N, rows // row_tile)
    block = (1, C, row_tile, lane)
    index_map = lambda n, r: (n, 0, r, 0)

    out = pl.pallas_call(
        _pixelnorm_kernel,
        out_shape=jax.ShapeDtypeStruct((N, C, rows, lane), x.dtype),
        grid_spec=pltpu.PrefetchScalarGridSpec(
            num_scalar_prefetch=0,
            grid=grid,
            in_specs=[pl.BlockSpec(block, index_map)],
            out_specs=pl.BlockSpec(block, index_map),
        ),
        compiler_params=pltpu.CompilerParams(
            dimension_semantics=("parallel", "parallel")),
        # Pure in-place normalization: reuse the input HBM buffer for the output.
        input_output_aliases={0: 0},
    )(x4)
    return out.reshape(N, C, H, W)


def pixel_norm_ref(x: jax.Array) -> jax.Array:
    # pure-JAX reference (mirrors the PyTorch module)
    return x / jnp.sqrt(jnp.mean(x ** 2, axis=1, keepdims=True) + EPS)


if __name__ == "__main__":
    key = jax.random.PRNGKey(0)
    x = jax.random.normal(key, (2, 4, 16, 16), dtype=jnp.float32)

    ref = pixel_norm_ref(x)          # compute reference before the (aliased) kernel call

    out = jax.block_until_ready(pixel_norm(x))

    assert out.shape == x.shape and out.dtype == x.dtype
    assert jnp.allclose(out, ref, atol=1e-5, rtol=1e-5), "mismatch vs reference"

    print("KERNEL_OK")
</pallas_src>

<mosaic_0001>
module attributes {stable_mosaic.version = 11 : i64} {
  func.func @_pixelnorm_kernel(%arg0: i32, %arg1: i32, %arg2: memref<1x4x1x256xf32, #tpu.memory_space<vmem>>, %arg3: memref<1x4x1x256xf32, #tpu.memory_space<vmem>>) attributes {dimension_semantics = [#tpu.dimension_semantics<parallel>, #tpu.dimension_semantics<parallel>], iteration_bounds = array<i64: 2, 1>, scalar_prefetch = 0 : i64, scratch_operands = 0 : i64, tpu.core_type = #tpu.core_type<tc>, window_params = [{transform_indices = @transform_0, window_bounds = array<i64: 1, 4, 1, 256>}, {transform_indices = @transform_1, window_bounds = array<i64: 1, 4, 1, 256>}]} {
    %c0 = arith.constant 0 : index
    %c0_0 = arith.constant 0 : index
    %c0_1 = arith.constant 0 : index
    %c0_2 = arith.constant 0 : index
    %0 = vector.load %arg2[%c0, %c0_0, %c0_1, %c0_2] : memref<1x4x1x256xf32, #tpu.memory_space<vmem>>, vector<1x4x1x256xf32>
    %1 = arith.mulf %0, %0 : vector<1x4x1x256xf32>
    %cst = arith.constant dense<0.000000e+00> : vector<1x1x256xf32>
    %2 = vector.multi_reduction <add>, %1, %cst [1] : vector<1x4x1x256xf32> to vector<1x1x256xf32>
    %3 = vector.shape_cast %2 : vector<1x1x256xf32> to vector<1x1x1x256xf32>
    %cst_3 = arith.constant 4.000000e+00 : f32
    %4 = vector.broadcast %cst_3 : f32 to vector<1x1x1x256xf32>
    %5 = arith.divf %3, %4 : vector<1x1x1x256xf32>
    %cst_4 = arith.constant 9.99999993E-9 : f32
    %6 = vector.broadcast %cst_4 : f32 to vector<1x1x1x256xf32>
    %7 = arith.addf %5, %6 : vector<1x1x1x256xf32>
    %8 = math.rsqrt %7 : vector<1x1x1x256xf32>
    %9 = vector.broadcast %8 : vector<1x1x1x256xf32> to vector<1x4x1x256xf32>
    %10 = arith.mulf %0, %9 : vector<1x4x1x256xf32>
    %c0_5 = arith.constant 0 : index
    %c0_6 = arith.constant 0 : index
    %c0_7 = arith.constant 0 : index
    %c0_8 = arith.constant 0 : index
    %11 = vector.load %arg3[%c0_5, %c0_6, %c0_7, %c0_8] : memref<1x4x1x256xf32, #tpu.memory_space<vmem>>, vector<1x4x1x256xf32>
    tpu.vector_store %arg3[%c0_5, %c0_6, %c0_7, %c0_8], %10 {strides = array<i32>} : memref<1x4x1x256xf32, #tpu.memory_space<vmem>>, vector<1x4x1x256xf32>,
    return
  }
  func.func @transform_0(%arg0: i32, %arg1: i32) -> (i32, i32, i32, i32) {
    %c0_i32 = arith.constant 0 : i32
    %c0_i32_0 = arith.constant 0 : i32
    %c0_i32_1 = arith.constant 0 : i32
    return %arg0, %c0_i32, %arg1, %c0_i32_0 : i32, i32, i32, i32
  }
  func.func @transform_1(%arg0: i32, %arg1: i32) -> (i32, i32, i32, i32) {
    %c0_i32 = arith.constant 0 : i32
    %c0_i32_0 = arith.constant 0 : i32
    %c0_i32_1 = arith.constant 0 : i32
    return %arg0, %c0_i32, %arg1, %c0_i32_0 : i32, i32, i32, i32
  }
}

</mosaic_0001>

<bundles_post_ra>
// kernel: tpu_custom_call.1
= control target key start
LH: loop header
LB: loop body
LE: loop exit
PB: predicated region body
PF: predicated region fallthrough
CT: control target
= control target key end

     0   :  { %6 = vsyncpa [#allocation3], 0  ;;  %s766_s0 = inlined_call_operand.hbm [shape: f32[2,4,1,256], index: 0, kind: input, shape index: {}, may-alias: {0,1}]   ;;  %s767_s1 = inlined_call_operand.hbm [shape: f32[2,4,1,256], index: 1, kind: output, shape index: {}, may-alias: {0,1}]  }
   0x1   :  { %8 = vsyncpa [#allocation3 + $0x1], 0 }
   0x2   :  { %9 = vsyncpa [#allocation4], 0 }
   0x3   :  { %11 = vsyncpa [#allocation4 + $0x1], 0  ;;  %s579_s6 = smov 0   ;;  %s581_s7 = smov 0  }
   0x4   :  { %s583_s8 = smov 0   ;;  %s585_s9 = smov 0  }
   0x5   :  { %s587_s10 = smov 0   ;;  %s589_s11 = smov 0  }
   0x6 LB: > { %s360_s12 = sadd.s32 4294967295, %s560_s11   ;;  %s361_s13 = sadd.s32 4294967294, %s560_s11   ;;  %s560_s11 = sphi %s589_s11, %s17_s11   ;;  %s556_s10 = sphi %s587_s10, %s782_s10   ;;  %s552_s9 = sphi %s585_s9, %s781_s9   ;;  %s548_s8 = sphi %s583_s8, %s780_s8   ;;  %s544_s7 = sphi %s581_s7, %s779_s7   ;;  %s540_s6 = sphi %s579_s6, %s778_s6  }
   0x7   : > { %s29_s14 = sadd.s32 1, %s556_s10  ;;  %s38_s15 = sadd.s32 1, %s548_s8 }
   0x8   : > { %p31_p0 = scmp.ge.s32.totalorder %s29_s14, 2  ;;  %p45_p1 = scmp.ne.s32.totalorder %s548_s8, %s544_s7 }
   0x9   : > { %p46_p2 = scmp.eq.s32.totalorder %s560_s11, 0  ;;  %p51_p3 = scmp.ne.s32.totalorder %s544_s7, %s540_s6 }
   0xa   : > { %s784_s14 = smov (%p31_p0, %s29_s14), 0  ;;  %p52_p5 = scmp.eq.s32.totalorder %s360_s12, 0 }
   0xb   : > { %p620_p4 = por %p46_p2, %p45_p1  ;;  %s33_s17 = ssub.s32 %s556_s10, %s784_s14 }
   0xc   : > { %p77_p6 = scmp.eq.s32.totalorder %s360_s12, 1  ;;  %p36_p7 = scmp.eq.s32.totalorder %s33_s17, 0 }
   0xd   : > { %p626_p8 = por %p52_p5, %p51_p3  ;;  %p83_p10 = scmp.eq.s32.totalorder %s361_s13, 1 }
   0xe   : > { %p630_p9 = por %p77_p6, %p45_p1  ;;  %p389_p13 = scmp.lt.s32.totalorder %s560_s11, 2 }
   0xf   : > { %s635_s20 = scalar_select %p36_p7, %s548_s8, %s38_s15  }
  0x10   : > { %s771_s19 = scalar_select %p630_p9, 1, 0 }
  0x11   : > { %p637_p11 = por %p83_p10, %p51_p3  ;;  %s103_s22 = sand.u32 1, %s548_s8  }
  0x12   : > { %s364_s23 = sshll.u32 %s103_s22, 3  ;;  %s375_s24 = sshll.u32 %s556_s10, 7 }
  0x13   : > { %s772_s21 = scalar_select %p637_p11, 1, 0 }
  0x14   : > { %s648_s27 = scalar_lea.hbm %s766_s0, %s375_s24  ;;  %s107_s28 = scalar_lea.vmem [#allocation2], %s364_s23 }
  0x15   : > { %s116_s29 = sshll.u32 %s107_s28, 4  ;;  %p654_p0 = pnand %p389_p13, %p620_p4  ;;  %s650_s29 = int_to_ptr.vmem [resolvable:$true] %s116_s29 }
  0x16   : > { %s659_s2 = scalar_lea.sflag [#allocation3], %s103_s22  ;;  %s448_s3 = scalar_lea.hbm %s648_s27, 128 }
  0x17   : > { %p449_p2 = scmp.ne.s32.totalorder %s648_s27, %s448_s3  ;;  %p450_p3 = pneg %p654_p0 }
  0x18   : > { %s453_s12 = scalar_lea.hbm %s766_s0, 256  ;;  %p454_p4 = scmp.lt.u32.totalorder %s648_s27, %s766_s0 }
  0x19   : > { %p451_p5 = pnand %p450_p3, %p449_p2  ;;  %p455_p7 = scmp.lt.u32.totalorder %s453_s12, %s448_s3 }
  0x1a   : > { %p457_p13 = scmp.lt.u32.totalorder %s448_s3, %s648_s27 }
  0x1b   : > { %p452_p6 = pneg %p451_p5  ;;  %p456_p10 = por %p455_p7, %p454_p4 }
  0x1d   : > { %p458_p12 = por %p457_p13, %p456_p10 }
  0x1f   : > { %p459_p1 = pnand %p458_p12, %p452_p6 }
  0x21   : > { %462 = shalt.err (!%p459_p1)
}
  0x22   : > { %s463_s16 = scalar_lea.vmem %s650_s29, 128  ;;  %s562_s17 = smov [#allocation2]  }
  0x23   : > { %p464_p2 = scmp.ne.s32.totalorder %s650_s29, %s463_s16  ;;  %s468_s22 = sshll.u32 %s562_s17, 4  ;;  %s469_s22 = int_to_ptr.vmem [resolvable:$false] %s468_s22 }
  0x24   : > { %s470_s23 = scalar_lea.vmem %s469_s22, 256  ;;  %p471_p9 = scmp.lt.s32.totalorder %s650_s29, %s469_s22 }
  0x25   : > { %p466_p5 = pnand %p464_p2, %p450_p3  ;;  %p472_p4 = scmp.lt.s32.totalorder %s470_s23, %s463_s16 }
  0x27   : > { %p467_p11 = pneg %p466_p5  ;;  %p473_p7 = por %p472_p4, %p471_p9 }
  0x29   : > { %p474_p10 = pnand %p473_p7, %p467_p11 }
  0x2b   : > { %477 = shalt.err (!%p474_p10)
}
  0x2c   : > { %s563_s24 = smov 32   ;;  %s564_s25 = smov 2  }
  0x2d   : > { %384 = dma.hbm_to_vmem [thread:$0]  (!%p654_p0), %s648_s27, 128, %s650_s29, %s659_s2, %s563_s24, %s563_s24, %s564_s25  }
  0x2e   : > { %p124_p12 = scmp.lt.s32.totalorder %s560_s11, 3  ;;  %p774_p1 = scmp.ge.s32.totalorder %s560_s11, 1 }
  0x30   : > { %p125_p3 = pnand %p774_p1, %p124_p12 }
  0x31   : > { %s691_s26 = sand.u32 (!%p125_p3), 1, %s544_s7  }
  0x32   : > { %128 = sbr.rel (%p125_p3) target bundleno = 113 (0x71), region = 24  ;;  %s368_s28 = sshll.u32 (!%p125_p3), %s691_s26, 3 }
  0x33   : > { %s131_s3 = scalar_lea.sflag (!%p125_p3), [#allocation3], %s691_s26  ;;  %s134_s4 = scalar_lea.vmem (!%p125_p3), [#allocation2], %s368_s28 }
  0x39   : > { %531 = dma.done.wait (%p626_p8), %s131_s3, 128  }
  0x3a   : > { %533 = vsyncadd (%p626_p8), %s131_s3, 4294967168  ;;  %v165_v0 = vlaneseq  ;;  %v153_v4 = vld [vmem:[%s134_s4] sm:$0x3]  ;;  %v154_v5 = vld [vmem:[%s134_s4 + $0x2] sm:$0x3]  ;;  %vm205_vm0 = vcmask 1040384  }
  0x3b   : > { %v155_v6 = vld [vmem:[%s134_s4 + $0x4] sm:$0x3]  ;;  %v156_v7 = vld [vmem:[%s134_s4 + $0x6] sm:$0x3]  ;;  %v157_v8 = vmul.f32 %v153_v4, %v153_v4  ;;  %v158_v9 = vmul.f32 %v154_v5, %v154_v5  ;;  %v565_v38 = vmov 1966171168  }
  0x3c   : > { %v166_v1 = vshrl.u32 %v165_v0, 7  ;;  %v159_v10 = vmul.f32 %v155_v6, %v155_v6  ;;  %v160_v11 = vmul.f32 %v156_v7, %v156_v7  ;;  %v231_v39 = vunpack.c.l.s4 %v565_v38  ;;  %s152_s18 = scalar_lea.vmem [#allocation5], %s368_s28  ;;  %s376_s29 = sshll.u32 %s552_s9, 7 }
  0x3d   : > { %s273_s27 = sshll.u32 %s152_s18, 4  ;;  %vm251_vm1 = vcmp.lt.s32.totalorder %v165_v0, 256  ;;  %s717_s5 = scalar_lea.hbm %s767_s1, %s376_s29  ;;  %s712_s27 = int_to_ptr.vmem [resolvable:$true] %s273_s27 }
  0x3e   : > { %v167_v2 = vsub.s32 0, %v166_v1  ;;  %v171_v3 = vsub.s32 1, %v166_v1  ;;  %v232_v40 = vunpack.c.0.s8 %v231_v39  ;;  %s258_s9 = scalar_lea.sflag [#allocation4], %s691_s26  ;;  %s478_s12 = scalar_lea.vmem %s712_s27, 128 }
  0x3f   : > { %p479_p8 = scmp.ne.s32.totalorder %s712_s27, %s478_s12  ;;  %p775_p9 = scmp.ne.s32.totalorder %s771_s19, 0 }
  0x40   : > { %v168_v12 = vrot.slane %v157_v8, %v167_v2  ;;  %v172_v13 = vrot.slane %v157_v8, %v171_v3  ;;  %v176_v14 = vrot.slane %v158_v9, %v167_v2  ;;  %v180_v15 = vrot.slane %v158_v9, %v171_v3  ;;  %s566_s13 = smov [#allocation5]  }
  0x41   : > { %v184_v16 = vrot.slane %v159_v10, %v167_v2  ;;  %v188_v17 = vrot.slane %v159_v10, %v171_v3  ;;  %v192_v18 = vrot.slane %v160_v11, %v167_v2  ;;  %v196_v19 = vrot.slane %v160_v11, %v171_v3  ;;  %p480_p11 = pnand %p479_p8, %p775_p9  ;;  %s482_s15 = sshll.u32 %s566_s13, 4  ;;  %s483_s15 = int_to_ptr.vmem [resolvable:$false] %s482_s15 }
  0x42   : > { %v206_v20 = vsel %vm205_vm0, %v168_v12, 0.0  ;;  %v207_v21 = vsel %vm205_vm0, %v176_v14, 0.0  ;;  %v213_v22 = vsel %vm205_vm0, %v172_v13, 0.0  ;;  %v214_v23 = vsel %vm205_vm0, %v180_v15, 0.0  ;;  %s484_s16 = scalar_lea.vmem %s483_s15, 256  ;;  %p485_p6 = scmp.lt.s32.totalorder %s712_s27, %s483_s15 }
  0x43   : > { %v208_v24 = vadd.f32 %v207_v21, %v206_v20  ;;  %v209_v25 = vsel %vm205_vm0, %v184_v16, 0.0  ;;  %v215_v26 = vadd.f32 %v214_v23, %v213_v22  ;;  %v211_v27 = vsel %vm205_vm0, %v192_v18, 0.0  ;;  %p481_p0 = pneg %p480_p11  ;;  %p486_p13 = scmp.lt.s32.totalorder %s484_s16, %s478_s12 }
  0x44   : > { %v216_v28 = vsel %vm205_vm0, %v188_v17, 0.0  ;;  %v218_v29 = vsel %vm205_vm0, %v196_v19, 0.0  ;;  %v235_v42 = vsub.s32 %v232_v40, %v166_v1 }
  0x45   : > { %v210_v30 = vadd.f32 %v209_v25, %v208_v24  ;;  %v217_v31 = vadd.f32 %v216_v28, %v215_v26  ;;  %p487_p2 = por %p486_p13, %p485_p6 }
  0x47   : > { %v212_v32 = vadd.f32 %v211_v27, %v210_v30  ;;  %v219_v33 = vadd.f32 %v218_v29, %v217_v31  ;;  %p488_p5 = pnand %p487_p2, %p481_p0 }
  0x49   : > { %v221_v34 = vmul.f32 0.25, %v212_v32  ;;  %v222_v35 = vmul.f32 0.25, %v219_v33 }
  0x4b   : > { %v223_v36 = vadd.f32 1e-08, %v221_v34  ;;  %v224_v37 = vadd.f32 1e-08, %v222_v35 }
  0x4d   : > { %444 = vrsqrt.f32 %v223_v36 }
  0x4e   : > { %446 = vrsqrt.f32 %v224_v37 }
  0x57   : > { %v445_v41 = vpop.eup %444 }
  0x58   : > { %v447_v43 = vpop.eup %446 }
  0x59   : > { %v229_v44 = vcombine.low %v445_v41, %v447_v43 }
  0x5b   : > { %v236_v45 = vrot.slane %v229_v44, %v235_v42 }
  0x5d   : > { %v243_v46 = vrot.slane %v236_v45, %v235_v42 }
  0x5f   : > { %v245_v47 = vmul.f32 %v243_v46, %v153_v4  ;;  %v246_v48 = vmul.f32 %v243_v46, %v154_v5  ;;  %v247_v49 = vmul.f32 %v243_v46, %v155_v6  ;;  %v248_v50 = vmul.f32 %v243_v46, %v156_v7 }
  0x61   : > { %253 = vst.msk [vmem:[%s152_s18] sm:$0x3] %vm251_vm1, %v245_v47  ;;  %254 = vst.msk [vmem:[%s152_s18 + $0x2] sm:$0x3] %vm251_vm1, %v246_v48 }
  0x62   : > { %255 = vst.msk [vmem:[%s152_s18 + $0x4] sm:$0x3] %vm251_vm1, %v247_v49  ;;  %256 = vst.msk [vmem:[%s152_s18 + $0x6] sm:$0x3] %vm251_vm1, %v248_v50 }
  0x63   : > { %491 = shalt.err (!%p488_p5)
}
  0x64   : > { %s492_s17 = scalar_lea.hbm %s717_s5, 128  ;;  %s496_s24 = scalar_lea.hbm %s767_s1, 256 }
  0x65   : > { %p493_p4 = scmp.ne.s32.totalorder %s717_s5, %s492_s17  ;;  %p497_p12 = scmp.lt.u32.totalorder %s717_s5, %s767_s1 }
  0x66   : > { %p498_p1 = scmp.lt.u32.totalorder %s496_s24, %s492_s17  ;;  %p500_p8 = scmp.lt.u32.totalorder %s492_s17, %s717_s5 }
  0x67   : > { %p494_p7 = pnand %p493_p4, %p775_p9 }
  0x68   : > { %p499_p3 = por %p498_p1, %p497_p12 }
  0x69   : > { %p495_p10 = pneg %p494_p7 }
  0x6a   : > { %p501_p11 = por %p500_p8, %p499_p3 }
  0x6c   : > { %p502_p0 = pnand %p501_p11, %p495_p10 }
  0x6e   : > { %505 = shalt.err (!%p502_p0)
}
  0x6f   : > { %s567_s3 = smov 32   ;;  %s568_s4 = smov 2  }
  0x70   : > { %379 = dma.vmem_to_hbm [thread:$0]  (%p775_p9), %s712_s27, 128, %s717_s5, %s258_s9, %s567_s3, %s567_s3, %s568_s4  }
  0x71 PF: > { %s288_s18 = sand.u32 1, %s540_s6   ;;  %p776_p6 = scmp.ne.s32.totalorder %s772_s21, 0 }
  0x72   : > { %p777_p13 = scmp.ge.s32.totalorder %s560_s11, 2  ;;  %s289_s29 = scalar_lea.sflag [#allocation4], %s288_s18 }
  0x74   : > { %p386_p2 = pnand %p777_p13, %p776_p6 }
  0x76   : > { %535 = dma.done.wait (!%p386_p2), %s289_s29, 128  }
  0x77   : > { %537 = vsyncadd (!%p386_p2), %s289_s29, 4294967168  ;;  %s17_s11 = sadd.s32 1, %s560_s11   ;;  %s778_s6 = smov %s544_s7 }
  0x78   : > { %p14_p5 = scmp.ge.s32.totalorder %s17_s11, 4   ;;  %s779_s7 = smov %s548_s8 }
  0x79   : > { %s780_s8 = smov %s635_s20  ;;  %s781_s9 = smov %s556_s10 }
  0x7a   : > { %s782_s10 = smov %s784_s14  ;;  %16 = sbr.rel (!%p14_p5) target bundleno = 6 (0x6), region = 69 }
  0x81   :  { %294 = vsyncpa [#allocation3], 1 }
  0x82   :  { %296 = vsyncpa [#allocation3 + $0x1], 1 }
  0x83   :  { %297 = vsyncpa [#allocation4], 1 }
  0x84   :  { %299 = vsyncpa [#allocation4 + $0x1], 1 }

</bundles_post_ra>
